<compile_context>
chip_gen: v6e
topology: v6e:2x2x1
jax: 0.10.0
libtpu: 0.0.40
codegen_flags: <defaults>
</compile_context>

<pallas_src>
import functools

import jax
import jax.numpy as jnp
from jax.experimental import pallas as pl
from jax.experimental.pallas import tpu as pltpu


def _round_up(x, m):
    return (x + m - 1) // m * m


# ---------------------------------------------------------------------------
# Kernels
# ---------------------------------------------------------------------------

def _ffn_resident_kernel(x_ref, w1_ref, b1_ref, w2_ref, b2_ref, o_ref):
    """Fast path: full d_ff resident in VMEM; one M tile per grid step."""
    # (tm, d_model_p) @ (d_model_p, d_ff_p) on the MXU, f32 accumulation.
    h = jnp.dot(x_ref[...], w1_ref[...], preferred_element_type=jnp.float32)
    h = jnp.maximum(h + b1_ref[...], 0.0)
    out = jnp.dot(h.astype(w2_ref.dtype), w2_ref[...],
                  preferred_element_type=jnp.float32)
    o_ref[...] = (out + b2_ref[...]).astype(o_ref.dtype)


def _ffn_reduce_kernel(x_ref, w1_ref, b1_ref, w2_ref, b2_ref, o_ref, acc_ref):
    """General path: d_ff tiled as the inner reduction axis, f32 accumulator."""
    k = pl.program_id(1)
    tf = w1_ref.shape[1]

    h = jnp.dot(x_ref[...], w1_ref[...], preferred_element_type=jnp.float32)
    off = pl.multiple_of(k * tf, 128)
    h = jnp.maximum(h + b1_ref[:, pl.ds(off, tf)], 0.0)
    part = jnp.dot(h.astype(w2_ref.dtype), w2_ref[...],
                   preferred_element_type=jnp.float32)

    @pl.when(k == 0)
    def _():
        # Fold b2 into the first partial sum: no zero-fill, no finalize add.
        acc_ref[...] = part + b2_ref[...]

    @pl.when(k > 0)
    def _():
        acc_ref[...] += part

    @pl.when(k == pl.num_programs(1) - 1)
    def _():
        o_ref[...] = acc_ref[...].astype(o_ref.dtype)


# ---------------------------------------------------------------------------
# Generation-aware parameters
# ---------------------------------------------------------------------------

@functools.lru_cache(maxsize=1)
def _tpu_params():
    """Returns (vmem_limit_bytes, default_block_m, tensorcores_per_chip)."""
    vmem_cap = None
    try:
        vmem_cap = int(pltpu.get_tpu_info().vmem_capacity_bytes)
    except Exception:
        vmem_cap = None
    kind = ""
    try:
        kind = jax.devices()[0].device_kind.lower()
    except Exception:
        pass
    if vmem_cap is None:
        if "v7" in kind:
            vmem_cap = 64 * 1024 * 1024        # per-TensorCore on v7x
        elif "v5" in kind or "v6" in kind:
            vmem_cap = 128 * 1024 * 1024
        else:
            vmem_cap = 64 * 1024 * 1024        # conservative default
    vmem_limit = (vmem_cap * 3) // 4           # leave compiler headroom

    if "v7" in kind:
        return vmem_limit, 512, 2              # high HBM BW, small VMEM, 2 TCs
    if "v6" in kind:
        return vmem_limit, 1024, 1             # needs tm >= ~700 to be MXU-bound
    return vmem_limit, 512, 1                  # v5e / unknown


# ---------------------------------------------------------------------------
# Wrapper
# ---------------------------------------------------------------------------

@functools.partial(jax.jit, static_argnames=("block_m", "block_f", "compute_dtype"))
def feed_forward_layer(x, w1, b1, w2, b2, *, block_m=None, block_f=None,
                       compute_dtype=jnp.bfloat16):
    """FFN over the last axis: relu(x @ w1 + b1) @ w2 + b2.

    x: (batch, seq, d_model); w1: (d_model, d_ff); w2: (d_ff, d_model).
    Weights are stored transposed relative to PyTorch nn.Linear.
    """
    batch, seq, d_model = x.shape
    d_ff = w1.shape[1]
    out_dtype = x.dtype
    out_isz = jnp.dtype(out_dtype).itemsize
    cdt_isz = jnp.dtype(compute_dtype).itemsize
    M = batch * seq

    vmem_limit, default_bm, num_tc = _tpu_params()
    budget = (vmem_limit * 9) // 10

    # ---- padded geometry ----------------------------------------------------
    d_model_p = _round_up(d_model, 128)        # lane-dense last dims
    m_granule = 16                             # bf16 packs 16 sublanes per vreg
    tm = min(block_m if block_m is not None else default_bm,
             _round_up(M, m_granule))
    tm = _round_up(tm, m_granule)
    if num_tc >= 2 and _round_up(M, m_granule) >= 2 * m_granule:
        # Keep the parallel M axis >= 2 grid steps so both TensorCores get work.
        tm = min(tm, _round_up((M + num_tc - 1) // num_tc, m_granule))

    d_ff_128 = _round_up(d_ff, 128)

    # ---- conservative VMEM working-set estimates (inputs double-buffered) ----
    def _fast_vmem(tm_c):
        return (2 * (d_model_p * d_ff_128 + d_ff_128 * d_model_p) * cdt_isz  # W1+W2
                + 2 * (d_ff_128 + d_model_p) * 4                             # biases
                + 2 * tm_c * d_model_p * cdt_isz                             # x tiles
                + 2 * tm_c * d_model_p * out_isz                             # out tiles
                + tm_c * d_ff_128 * (4 + cdt_isz))                           # h temps

    def _gen_vmem(tm_c, tf_c):
        return (2 * tm_c * d_model_p * cdt_isz                               # x tiles
                + 2 * (d_model_p * tf_c + tf_c * d_model_p) * cdt_isz        # W1/W2 tiles
                + 2 * (d_ff_128 + d_model_p) * 4                             # biases
                + tm_c * d_model_p * 4                                       # f32 acc
                + 2 * tm_c * d_model_p * out_isz                             # out tiles
                + tm_c * tf_c * (4 + cdt_isz))                               # h temps

    # ---- path selection ------------------------------------------------------
    use_fast, tm_fast = False, tm
    for cand in sorted({tm, 512, 256, 128, 64, 32, 16}, reverse=True):
        if cand > tm:
            continue
        if _fast_vmem(cand) <= budget:
            use_fast, tm_fast = True, cand
            break

    if use_fast:
        tm = tm_fast
        tf = d_ff_128
        d_ff_p = d_ff_128
    else:
        tf = min(block_f if block_f is not None else 512, d_ff_128)
        tf = _round_up(tf, 128)
        while tm > m_granule and _gen_vmem(tm, tf) > budget:
            tm = max(m_granule, _round_up(tm // 2, m_granule))
        while tf > 128 and _gen_vmem(tm, tf) > budget:
            tf = max(128, _round_up(tf // 2, 128))
        d_ff_p = _round_up(d_ff, tf)

    M_p = _round_up(M, tm)
    n_m = M_p // tm

    # ---- pad operands (zeros keep the math exact; result is sliced back) -----
    x2d = jnp.pad(x.reshape(M, d_model),
                  ((0, M_p - M), (0, d_model_p - d_model))).astype(compute_dtype)
    w1_p = jnp.pad(w1, ((0, d_model_p - d_model), (0, d_ff_p - d_ff))).astype(compute_dtype)
    w2_p = jnp.pad(w2, ((0, d_ff_p - d_ff), (0, d_model_p - d_model))).astype(compute_dtype)
    b1_p = jnp.pad(b1, (0, d_ff_p - d_ff)).reshape(1, d_ff_p).astype(jnp.float32)
    b2_p = jnp.pad(b2, (0, d_model_p - d_model)).reshape(1, d_model_p).astype(jnp.float32)

    flops = 4 * M_p * d_model_p * d_ff_p
    x_bytes = x2d.size * cdt_isz
    w_bytes = (w1_p.size + w2_p.size) * cdt_isz
    b_bytes = (b1_p.size + b2_p.size) * 4
    o_bytes = M_p * d_model_p * out_isz

    if use_fast:
        cost = pl.CostEstimate(flops=flops, transcendentals=0,
                               bytes_accessed=x_bytes + w_bytes + b_bytes + o_bytes)
        out2d = pl.pallas_call(
            _ffn_resident_kernel,
            out_shape=jax.ShapeDtypeStruct((M_p, d_model_p), out_dtype),
            grid_spec=pltpu.PrefetchScalarGridSpec(
                num_scalar_prefetch=0,
                grid=(n_m,),
                in_specs=[
                    pl.BlockSpec((tm, d_model_p), lambda i: (i, 0)),       # x tile
                    pl.BlockSpec((d_model_p, d_ff_p), lambda i: (0, 0)),   # W1 resident
                    pl.BlockSpec((1, d_ff_p), lambda i: (0, 0)),           # b1 resident
                    pl.BlockSpec((d_ff_p, d_model_p), lambda i: (0, 0)),   # W2 resident
                    pl.BlockSpec((1, d_model_p), lambda i: (0, 0)),        # b2 resident
                ],
                out_specs=pl.BlockSpec((tm, d_model_p), lambda i: (i, 0)),
            ),
            compiler_params=pltpu.CompilerParams(
                dimension_semantics=("parallel",),
                vmem_limit_bytes=vmem_limit,
            ),
            cost_estimate=cost,
        )(x2d, w1_p, b1_p, w2_p, b2_p)
    else:
        cost = pl.CostEstimate(
            flops=flops, transcendentals=0,
            # Weights are re-streamed once per M tile on this path.
            bytes_accessed=x_bytes + n_m * w_bytes + b_bytes + o_bytes)
        out2d = pl.pallas_call(
            _ffn_reduce_kernel,
            out_shape=jax.ShapeDtypeStruct((M_p, d_model_p), out_dtype),
            grid_spec=pltpu.PrefetchScalarGridSpec(
                num_scalar_prefetch=0,
                grid=(n_m, d_ff_p // tf),
                in_specs=[
                    pl.BlockSpec((tm, d_model_p), lambda i, k: (i, 0)),    # x tile
                    pl.BlockSpec((d_model_p, tf), lambda i, k: (0, k)),    # W1 slice
                    pl.BlockSpec((1, d_ff_p), lambda i, k: (0, 0)),        # b1 (full, once)
                    pl.BlockSpec((tf, d_model_p), lambda i, k: (k, 0)),    # W2 slice
                    pl.BlockSpec((1, d_model_p), lambda i, k: (0, 0)),     # b2
                ],
                out_specs=pl.BlockSpec((tm, d_model_p), lambda i, k: (i, 0)),
                scratch_shapes=[pltpu.VMEM((tm, d_model_p), jnp.float32)],
            ),
            compiler_params=pltpu.CompilerParams(
                dimension_semantics=("parallel", "arbitrary"),
                vmem_limit_bytes=vmem_limit,
            ),
            cost_estimate=cost,
        )(x2d, w1_p, b1_p, w2_p, b2_p)

    return out2d[:M, :d_model].reshape(batch, seq, d_model)


def _ref_ffn(x, w1, b1, w2, b2):
    h = jnp.maximum(jnp.einsum("bsd,df->bsf", x, w1) + b1, 0.0)
    return jnp.einsum("bsf,fd->bsd", h, w2) + b2


if __name__ == "__main__":
    # Small shapes consistent with the module.
    batch, seq = 2, 8
    d_model, forward_expansion = 32, 4
    d_ff = d_model * forward_expansion

    key = jax.random.PRNGKey(0)
    kx, k1, k2, k3, k4 = jax.random.split(key, 5)

    x = jax.random.normal(kx, (batch, seq, d_model), dtype=jnp.float32)

    # PyTorch nn.Linear default init U(-1/sqrt(fan_in), 1/sqrt(fan_in)),
    # stored transposed as (in_features, out_features).
    lim1 = 1.0 / (d_model ** 0.5)
    lim2 = 1.0 / (d_ff ** 0.5)
    w1 = jax.random.uniform(k1, (d_model, d_ff), jnp.float32, -lim1, lim1)
    b1 = jax.random.uniform(k2, (d_ff,), jnp.float32, -lim1, lim1)
    w2 = jax.random.uniform(k3, (d_ff, d_model), jnp.float32, -lim2, lim2)
    b2 = jax.random.uniform(k4, (d_model,), jnp.float32, -lim2, lim2)

    out = feed_forward_layer(x, w1, b1, w2, b2)
    jax.block_until_ready(out)

    ref = _ref_ffn(x, w1, b1, w2, b2)
    assert out.shape == (batch, seq, d_model)
    # bf16 MXU inputs (f32 accumulation) -> relaxed tolerance vs f32 reference.
    assert jnp.allclose(out, ref, atol=5e-2, rtol=5e-2), "mismatch vs reference"

    print("KERNEL_OK")
</pallas_src>

<mosaic_0001>
module attributes {stable_mosaic.version = 11 : i64} {
  func.func @_ffn_resident_kernel(%arg0: i32, %arg1: memref<16x128xbf16, #tpu.memory_space<vmem>>, %arg2: memref<128x128xbf16, #tpu.memory_space<vmem>>, %arg3: memref<1x128xf32, #tpu.memory_space<vmem>>, %arg4: memref<128x128xbf16, #tpu.memory_space<vmem>>, %arg5: memref<1x128xf32, #tpu.memory_space<vmem>>, %arg6: memref<16x128xf32, #tpu.memory_space<vmem>>) attributes {dimension_semantics = [#tpu.dimension_semantics<parallel>], iteration_bounds = array<i64: 1>, scalar_prefetch = 0 : i64, scratch_operands = 0 : i64, tpu.core_type = #tpu.core_type<tc>, window_params = [{transform_indices = @transform_0, window_bounds = array<i64: 16, 128>}, {pipeline_mode = #tpu.pipeline_mode<synchronous>, transform_indices = @transform_1, window_bounds = array<i64: 128, 128>}, {pipeline_mode = #tpu.pipeline_mode<synchronous>, transform_indices = @transform_2, window_bounds = array<i64: 1, 128>}, {pipeline_mode = #tpu.pipeline_mode<synchronous>, transform_indices = @transform_3, window_bounds = array<i64: 128, 128>}, {pipeline_mode = #tpu.pipeline_mode<synchronous>, transform_indices = @transform_4, window_bounds = array<i64: 1, 128>}, {transform_indices = @transform_5, window_bounds = array<i64: 16, 128>}]} {
    %c0 = arith.constant 0 : index
    %c0_0 = arith.constant 0 : index
    %0 = vector.load %arg1[%c0, %c0_0] : memref<16x128xbf16, #tpu.memory_space<vmem>>, vector<16x128xbf16>
    %c0_1 = arith.constant 0 : index
    %c0_2 = arith.constant 0 : index
    %1 = vector.load %arg2[%c0_1, %c0_2] : memref<128x128xbf16, #tpu.memory_space<vmem>>, vector<128x128xbf16>
    %cst = arith.constant dense<0.000000e+00> : vector<16x128xf32>
    %2 = tpu.matmul %0, %1, %cst {dimension_numbers = #tpu.dot_dimension_numbers<[1], [0], [0], [1], [0, 0, 1, 1], [], []>} : vector<16x128xbf16>, vector<128x128xbf16>, vector<16x128xf32> -> vector<16x128xf32>
    %c0_3 = arith.constant 0 : index
    %c0_4 = arith.constant 0 : index
    %3 = vector.load %arg3[%c0_3, %c0_4] : memref<1x128xf32, #tpu.memory_space<vmem>>, vector<1x128xf32>
    %4 = vector.broadcast %3 : vector<1x128xf32> to vector<16x128xf32>
    %5 = arith.addf %2, %4 : vector<16x128xf32>
    %cst_5 = arith.constant 0.000000e+00 : f32
    %6 = vector.broadcast %cst_5 : f32 to vector<16x128xf32>
    %7 = arith.maximumf %5, %6 : vector<16x128xf32>
    %8 = arith.truncf %7 : vector<16x128xf32> to vector<16x128xbf16>
    %c0_6 = arith.constant 0 : index
    %c0_7 = arith.constant 0 : index
    %9 = vector.load %arg4[%c0_6, %c0_7] : memref<128x128xbf16, #tpu.memory_space<vmem>>, vector<128x128xbf16>
    %cst_8 = arith.constant dense<0.000000e+00> : vector<16x128xf32>
    %10 = tpu.matmul %8, %9, %cst_8 {dimension_numbers = #tpu.dot_dimension_numbers<[1], [0], [0], [1], [0, 0, 1, 1], [], []>} : vector<16x128xbf16>, vector<128x128xbf16>, vector<16x128xf32> -> vector<16x128xf32>
    %c0_9 = arith.constant 0 : index
    %c0_10 = arith.constant 0 : index
    %11 = vector.load %arg5[%c0_9, %c0_10] : memref<1x128xf32, #tpu.memory_space<vmem>>, vector<1x128xf32>
    %12 = vector.broadcast %11 : vector<1x128xf32> to vector<16x128xf32>
    %13 = arith.addf %10, %12 : vector<16x128xf32>
    %c0_11 = arith.constant 0 : index
    %c0_12 = arith.constant 0 : index
    %14 = vector.load %arg6[%c0_11, %c0_12] : memref<16x128xf32, #tpu.memory_space<vmem>>, vector<16x128xf32>
    tpu.vector_store %arg6[%c0_11, %c0_12], %13 {strides = array<i32>} : memref<16x128xf32, #tpu.memory_space<vmem>>, vector<16x128xf32>,
    return
  }
  func.func @transform_0(%arg0: i32) -> (i32, i32) {
    %c0_i32 = arith.constant 0 : i32
    %c0_i32_0 = arith.constant 0 : i32
    return %arg0, %c0_i32 : i32, i32
  }
  func.func @transform_1(%arg0: i32) -> (i32, i32) {
    %c0_i32 = arith.constant 0 : i32
    %c0_i32_0 = arith.constant 0 : i32
    %c0_i32_1 = arith.constant 0 : i32
    return %c0_i32, %c0_i32_0 : i32, i32
  }
  func.func @transform_2(%arg0: i32) -> (i32, i32) {
    %c0_i32 = arith.constant 0 : i32
    %c0_i32_0 = arith.constant 0 : i32
    %c0_i32_1 = arith.constant 0 : i32
    return %c0_i32, %c0_i32_0 : i32, i32
  }
  func.func @transform_3(%arg0: i32) -> (i32, i32) {
    %c0_i32 = arith.constant 0 : i32
    %c0_i32_0 = arith.constant 0 : i32
    %c0_i32_1 = arith.constant 0 : i32
    return %c0_i32, %c0_i32_0 : i32, i32
  }
  func.func @transform_4(%arg0: i32) -> (i32, i32) {
    %c0_i32 = arith.constant 0 : i32
    %c0_i32_0 = arith.constant 0 : i32
    %c0_i32_1 = arith.constant 0 : i32
    return %c0_i32, %c0_i32_0 : i32, i32
  }
  func.func @transform_5(%arg0: i32) -> (i32, i32) {
    %c0_i32 = arith.constant 0 : i32
    %c0_i32_0 = arith.constant 0 : i32
    return %arg0, %c0_i32 : i32, i32
  }
}

</mosaic_0001>

<bundles_post_ra>
// kernel: feed_forward_layer.1
= control target key start
LH: loop header
LB: loop body
LE: loop exit
PB: predicated region body
PF: predicated region fallthrough
CT: control target
= control target key end

     0   :  { %v358_v0 = vmov 0.0   ;;  %vm359_vm0 = vmmov 0   ;;  %s453_s1 = inlined_call_operand.vmem [shape: bf16[128,128], index: 1, kind: input, shape index: {}]   ;;  %s454_s3 = inlined_call_operand.vmem [shape: bf16[128,128], index: 3, kind: input, shape index: {}]   ;;  %s455_s0 = inlined_call_operand.vmem [shape: bf16[16,128], index: 0, kind: input, shape index: {}]   ;;  %s456_s2 = inlined_call_operand.vmem [shape: f32[1,128], index: 2, kind: input, shape index: {}]   ;;  %s457_s4 = inlined_call_operand.vmem [shape: f32[1,128], index: 4, kind: input, shape index: {}]   ;;  %s458_s5 = inlined_call_operand.vmem [shape: f32[16,128], index: 5, kind: output, shape index: {}]  }
   0x1   :  { %299 = vmatprep.subr.bf16.mxu0 %v358_v0  ;;  %v341_v1 = vld [vmem:[%s453_s1 + $0x38] sm:$0xff]   ;;  %315 = vmatprep.mubr.msk.bf16.mxu0 %vm359_vm0, %v358_v0  ;;  %v342_v2 = vld [vmem:[%s453_s1 + $0x30] sm:$0xff]   ;;  %v343_v3 = vld [vmem:[%s453_s1 + $0x28] sm:$0xff]  }
   0x2   :  { %319 = vmatprep.subr.bf16.mxu1 %v358_v0  ;;  %335 = vmatprep.mubr.msk.bf16.mxu1 %vm359_vm0, %v358_v0  ;;  %v350_v4 = vld [vmem:[%s454_s3 + $0x38] sm:$0xff]   ;;  %v344_v5 = vld [vmem:[%s453_s1 + $0x20] sm:$0xff]   ;;  %v351_v6 = vld [vmem:[%s454_s3 + $0x30] sm:$0xff]  }
   0x3   :  { %300 = vmatpush3.bf16.msra.mxu0 %v341_v1  ;;  %320 = vmatpush3.bf16.msra.mxu1 %v350_v4  ;;  %v345_v7 = vld [vmem:[%s453_s1 + $0x18] sm:$0xff]   ;;  %v352_v8 = vld [vmem:[%s454_s3 + $0x28] sm:$0xff]   ;;  %v346_v9 = vld [vmem:[%s453_s1 + $0x10] sm:$0xff]  }
   0x4   :  { %301 = vmatprep.subr.bf16.mxu0 %v358_v0  ;;  %321 = vmatprep.subr.bf16.mxu1 %v358_v0  ;;  %v353_v10 = vld [vmem:[%s454_s3 + $0x20] sm:$0xff]   ;;  %v347_v11 = vld [vmem:[%s453_s1 + $0x8] sm:$0xff]   ;;  %v354_v12 = vld [vmem:[%s454_s3 + $0x18] sm:$0xff]  }
   0x5   :  { %v348_v13 = vld [vmem:[%s453_s1] sm:$0xff]   ;;  %v355_v15 = vld [vmem:[%s454_s3 + $0x10] sm:$0xff]   ;;  %v356_v16 = vld [vmem:[%s454_s3 + $0x8] sm:$0xff]  }
   0x6   :  { %v349_v14 = vld [vmem:[%s455_s0] sm:$0xff]  }
   0x7   :  { %302 = vmatpush3.bf16.msra.mxu0 %v342_v2  ;;  %322 = vmatpush3.bf16.msra.mxu1 %v351_v6  ;;  %v357_v17 = vld [vmem:[%s454_s3] sm:$0xff]  }
   0x8   :  { %303 = vmatprep.subr.bf16.mxu0 %v358_v0  ;;  %323 = vmatprep.subr.bf16.mxu1 %v358_v0  ;;  %v262_v18 = vld [vmem:[%s456_s2] ss:$0 sm:$0xff] }
   0x9   :  { %v272_v28 = vld [vmem:[%s457_s4] ss:$0 sm:$0xff] }
   0xb   :  { %304 = vmatpush3.bf16.msra.mxu0 %v343_v3  ;;  %324 = vmatpush3.bf16.msra.mxu1 %v352_v8 }
   0xc   :  { %305 = vmatprep.subr.bf16.mxu0 %v358_v0  ;;  %325 = vmatprep.subr.bf16.mxu1 %v358_v0 }
   0xf   :  { %306 = vmatpush3.bf16.msra.mxu0 %v344_v5  ;;  %326 = vmatpush3.bf16.msra.mxu1 %v353_v10 }
  0x10   :  { %307 = vmatprep.subr.bf16.mxu0 %v358_v0  ;;  %327 = vmatprep.subr.bf16.mxu1 %v358_v0 }
  0x13   :  { %308 = vmatpush3.bf16.msra.mxu0 %v345_v7  ;;  %328 = vmatpush3.bf16.msra.mxu1 %v354_v12 }
  0x14   :  { %309 = vmatprep.subr.bf16.mxu0 %v358_v0  ;;  %329 = vmatprep.subr.bf16.mxu1 %v358_v0 }
  0x17   :  { %310 = vmatpush3.bf16.msra.mxu0 %v346_v9  ;;  %330 = vmatpush3.bf16.msra.mxu1 %v355_v15 }
  0x18   :  { %311 = vmatprep.subr.bf16.mxu0 %v358_v0  ;;  %331 = vmatprep.subr.bf16.mxu1 %v358_v0 }
  0x1b   :  { %312 = vmatpush3.bf16.msra.mxu0 %v347_v11  ;;  %332 = vmatpush3.bf16.msra.mxu1 %v356_v16 }
  0x1c   :  { %313 = vmatprep.subr.bf16.mxu0 %v358_v0  ;;  %333 = vmatprep.subr.bf16.mxu1 %v358_v0 }
  0x1f   :  { %314 = vmatpush3.bf16.msra.mxu0 %v348_v13  ;;  %334 = vmatpush3.bf16.msra.mxu1 %v357_v17 }
  0x22   :  { %316 = vmatmul.mubr.bf16.vlgmr.msra.gmra.mxu0 %v349_v14 }
  0xe2   :  { %v134_v19 = vpop.f32.mrf.mxu0 }
  0xe3   :  { %v135_v21 = vadd.f32 %v262_v18, %v134_v19 }
  0xe4   :  { %v317_v20 = vpop.f32.mrf.mxu0 }
  0xe5   :  { %v141_v25 = vmax.f32 %v135_v21, 0.0 }
  0xe6   :  { %v137_v22 = vpop.f32.mrf.mxu0 }
  0xe7   :  { %v138_v23 = vadd.f32 %v262_v18, %v137_v22 }
  0xe8   :  { %v318_v24 = vpop.f32.mrf.mxu0 }
  0xe9   :  { %v142_v26 = vmax.f32 %v138_v23, 0.0 }
  0xeb   :  { %v143_v27 = vpack.c.bf16 %v142_v26, %v141_v25 }
  0xed   :  { %336 = vmatmul.mubr.bf16.vlgmr.msra.gmra.mxu1 %v143_v27 }
 0x1ad   :  { %v249_v29 = vpop.f32.mrf.mxu1 }
 0x1ae   :  { %v250_v30 = vadd.f32 %v272_v28, %v249_v29 }
 0x1af   :  { %v337_v31 = vpop.f32.mrf.mxu1 }
 0x1b0   :  { %256 = vst [vmem:[%s458_s5] sm:$0xff] %v250_v30 }
 0x1b1   :  { %v252_v32 = vpop.f32.mrf.mxu1 }
 0x1b2   :  { %v253_v33 = vadd.f32 %v272_v28, %v252_v32 }
 0x1b3   :  { %v338_v34 = vpop.f32.mrf.mxu1 }
 0x1b4   :  { %257 = vst [vmem:[%s458_s5 + $0x8] sm:$0xff] %v253_v33 }

</bundles_post_ra>
